<compile_context>
chip_gen: v7x
topology: tpu7x:2x2x1
jax: 0.10.0
libtpu: 0.0.40
codegen_flags: <defaults>
</compile_context>

<pallas_src>
import functools

import jax
import jax.numpy as jnp
import numpy as np
from jax.experimental import pallas as pl
from jax.experimental.pallas import tpu as pltpu


def _simnorm_kernel(x_ref, o_ref, *, simnorm_dim):
    tr, h = x_ref.shape
    g = h // simnorm_dim
    # Load the dense (TR, H) tile, regroup on the value (not the Ref).
    x = x_ref[...].astype(jnp.float32).reshape(tr, g, simnorm_dim)
    m = jnp.max(x, axis=-1, keepdims=True)          # per-group max (stability)
    e = jnp.exp(x - m)
    s = jnp.sum(e, axis=-1, keepdims=True)          # per-group partition fn
    y = e * pl.reciprocal(s, approx=False)          # exact reciprocal (EUP slot)
    o_ref[...] = y.reshape(tr, h).astype(o_ref.dtype)


def _round_up(a, b):
    return (a + b - 1) // b * b


def _choose_block_rows(n_rows, hidden, simnorm_dim, itemsize):
    """Pick rows-per-grid-step from a conservative VMEM budget.

    Accounts for:
      * double-buffered in+out (TR, H) tiles in the input dtype, and
      * ~3 live f32 intermediates in the lane-padded (TR, G, dim) layout
        (dim sits on the 128-wide lane axis, so one such value costs
        ceil(G/8) vregs = ceil(G/8)*4096 bytes per row on-chip).
    """
    g = hidden // simnorm_dim
    padded_row = ((g + 7) // 8) * 4096          # one padded f32 intermediate / row
    io_row = 2 * 2 * hidden * itemsize          # in+out, double-buffered, / row
    per_row = 3 * padded_row + io_row
    budget = 24 * 1024 * 1024
    tr = max(8, min(2048, budget // per_row))
    tr = (tr // 8) * 8
    tr = min(tr, _round_up(n_rows, 8))
    return int(tr)


@functools.partial(jax.jit, static_argnames=("simnorm_dim", "block_rows"))
def simnorm(x, simnorm_dim: int, block_rows=None):
    shp = x.shape
    hidden = shp[-1]
    assert hidden % simnorm_dim == 0, "last dim must be divisible by simnorm_dim"
    n_rows = int(np.prod(shp[:-1])) if len(shp) > 1 else 1

    x2d = x.reshape(n_rows, hidden)

    if block_rows is None:
        tr = _choose_block_rows(n_rows, hidden, simnorm_dim, x.dtype.itemsize)
    else:
        tr = int(block_rows)
    tr = max(8, (tr // 8) * 8)

    rows_padded = _round_up(n_rows, tr)
    if rows_padded != n_rows:
        x2d = jnp.pad(x2d, ((0, rows_padded - n_rows), (0, 0)))

    out = pl.pallas_call(
        functools.partial(_simnorm_kernel, simnorm_dim=simnorm_dim),
        out_shape=jax.ShapeDtypeStruct((rows_padded, hidden), x.dtype),
        grid=(rows_padded // tr,),
        in_specs=[pl.BlockSpec((tr, hidden), lambda r: (r, 0))],
        out_specs=pl.BlockSpec((tr, hidden), lambda r: (r, 0)),
        compiler_params=pltpu.CompilerParams(
            dimension_semantics=("parallel",),
            vmem_limit_bytes=40 * 1024 * 1024,
        ),
    )(x2d)

    if rows_padded != n_rows:
        out = out[:n_rows]
    return out.reshape(shp)


if __name__ == "__main__":
    SIMNORM_DIM = 8   # TD-MPC2 default cfg.simnorm_dim

    def reference(x, dim):
        shp = x.shape
        xg = x.reshape(*shp[:-1], shp[-1] // dim, dim)
        return jax.nn.softmax(xg, axis=-1).reshape(shp)

    key = jax.random.PRNGKey(0)
    k1, k2 = jax.random.split(key)

    # Case 1: typical small config (batch=2, hidden=32 -> 4 groups of 8).
    x1 = jax.random.normal(k1, (2, 32), dtype=jnp.float32)
    y1 = jax.block_until_ready(simnorm(x1, SIMNORM_DIM))
    np.testing.assert_allclose(
        np.asarray(y1), np.asarray(reference(x1, SIMNORM_DIM)), atol=1e-6, rtol=1e-5)
    assert y1.shape == x1.shape and y1.dtype == x1.dtype

    # Case 2: 3-D input whose flattened row count (20) is not a multiple of the
    # forced small block size (8) -> exercises multi-block grid + row padding.
    x2 = jax.random.normal(k2, (4, 5, 48), dtype=jnp.float32)
    y2 = jax.block_until_ready(simnorm(x2, SIMNORM_DIM, block_rows=8))
    np.testing.assert_allclose(
        np.asarray(y2), np.asarray(reference(x2, SIMNORM_DIM)), atol=1e-6, rtol=1e-5)
    assert y2.shape == x2.shape and y2.dtype == x2.dtype

    print("KERNEL_OK")
</pallas_src>

<mosaic_0001>
module attributes {stable_mosaic.version = 11 : i64} {
  func.func @_simnorm_kernel(%arg0: i32, %arg1: memref<8x32xf32, #tpu.memory_space<vmem>>, %arg2: memref<8x32xf32, #tpu.memory_space<vmem>>) attributes {dimension_semantics = [#tpu.dimension_semantics<parallel>], iteration_bounds = array<i64: 1>, scalar_prefetch = 0 : i64, scratch_operands = 0 : i64, tpu.core_type = #tpu.core_type<tc>, window_params = [{transform_indices = @transform_0, window_bounds = array<i64: 8, 32>}, {transform_indices = @transform_1, window_bounds = array<i64: 8, 32>}]} {
    %c0 = arith.constant 0 : index
    %c0_0 = arith.constant 0 : index
    %0 = vector.load %arg1[%c0, %c0_0] : memref<8x32xf32, #tpu.memory_space<vmem>>, vector<8x32xf32>
    %1 = vector.shape_cast %0 : vector<8x32xf32> to vector<8x4x8xf32>
    %cst = arith.constant dense<0xFF800000> : vector<8x4xf32>
    %2 = vector.multi_reduction <maximumf>, %1, %cst [2] : vector<8x4x8xf32> to vector<8x4xf32>
    %3 = vector.shape_cast %2 : vector<8x4xf32> to vector<8x4x1xf32>
    %4 = vector.broadcast %3 : vector<8x4x1xf32> to vector<8x4x8xf32>
    %5 = arith.subf %1, %4 : vector<8x4x8xf32>
    %6 = math.exp %5 : vector<8x4x8xf32>
    %cst_1 = arith.constant dense<0.000000e+00> : vector<8x4xf32>
    %7 = vector.multi_reduction <add>, %6, %cst_1 [2] : vector<8x4x8xf32> to vector<8x4xf32>
    %8 = vector.shape_cast %7 : vector<8x4xf32> to vector<8x4x1xf32>
    %9 = tpu.reciprocal %8 : vector<8x4x1xf32> -> vector<8x4x1xf32>
    %10 = vector.broadcast %9 : vector<8x4x1xf32> to vector<8x4x8xf32>
    %11 = arith.mulf %6, %10 : vector<8x4x8xf32>
    %12 = vector.shape_cast %11 : vector<8x4x8xf32> to vector<8x32xf32>
    %c0_2 = arith.constant 0 : index
    %c0_3 = arith.constant 0 : index
    %13 = vector.load %arg2[%c0_2, %c0_3] : memref<8x32xf32, #tpu.memory_space<vmem>>, vector<8x32xf32>
    tpu.vector_store %arg2[%c0_2, %c0_3], %12 {strides = array<i32>} : memref<8x32xf32, #tpu.memory_space<vmem>>, vector<8x32xf32>,
    return
  }
  func.func @transform_0(%arg0: i32) -> (i32, i32) {
    %c0_i32 = arith.constant 0 : i32
    %c0_i32_0 = arith.constant 0 : i32
    return %arg0, %c0_i32 : i32, i32
  }
  func.func @transform_1(%arg0: i32) -> (i32, i32) {
    %c0_i32 = arith.constant 0 : i32
    %c0_i32_0 = arith.constant 0 : i32
    return %arg0, %c0_i32 : i32, i32
  }
}

</mosaic_0001>

<bundles_post_ra>
// kernel: simnorm.1
= control target key start
LH: loop header
LB: loop body
LE: loop exit
PB: predicated region body
PF: predicated region fallthrough
CT: control target
= control target key end

     0   :  { %s309_s8 = smov 104   ;;  %s310_s9 = smov 120   ;;  %v312_v1 = vmov 1983009808   ;;  %v24_v3 = vlaneseq  ;;  %v313_v4 = vmov 1934713408   ;;  %s370_s0 = inlined_call_operand.vmem [shape: f32[8,32], index: 0, kind: input, shape index: {}]   ;;  %s371_s1 = inlined_call_operand.vmem [shape: f32[8,32], index: 1, kind: output, shape index: {}]  }
   0x1   :  { %v8_v0 = vld [vmem:[%s370_s0] sm:$0xff]  ;;  %s311_s10 = smov 112   ;;  %v22_v2 = vunpack.c.l.s4 %v312_v1  ;;  %v54_v5 = vunpack.c.l.s4 %v313_v4  ;;  %vm87_vm0 = vcmask 60416   ;;  %v314_v31 = vmov 0.0   ;;  %s315_s0 = smov 16  }
   0x2   :  { %16 = vrot.lane.b32.xlu1 %v8_v0, %s309_s8  ;;  %10 = vrot.lane.b32.xlu0 %v8_v0, %s310_s9  ;;  %v25_v7 = vshrl.u32 %v24_v3, 7  ;;  %s316_s11 = smov 8   ;;  %s317_s12 = smov 24   ;;  %vm256_vm1 = vcmask 64512   ;;  %vm258_vm2 = vcmask 130048   ;;  %vm260_vm3 = vcmask 195584  }
   0x3   :  { %v23_v6 = vunpack.c.0.s8 %v22_v2  ;;  %v55_v10 = vunpack.c.0.s8 %v54_v5  ;;  %vm262_vm4 = vcmask 261120  }
   0x5   :  { %v331_v11 = vsub.s32 %v23_v6, %v25_v7  ;;  %v333_v17 = vsub.s32 %v55_v10, %v25_v7 }
   0x6   :  { %13 = vrot.lane.b32.xlu0 %v8_v0, %s311_s10 }
  0x74   :  { %v17_v8 = vpop.permute.xlu1 %16  ;;  %v11_v9 = vpop.permute.xlu0 %10 }
  0x75   :  { %v35_v12 = vcombine.low %v11_v9, %v17_v8  ;;  %v36_v13 = vcombine.high %v11_v9, %v17_v8 }
  0x77   :  { %v43_v18 = vrot.slane %v35_v12, %v331_v11  ;;  %v50_v19 = vrot.slane %v36_v13, %v331_v11 }
  0x78   :  { %v14_v14 = vpop.permute.xlu0 %13 }
  0x79   :  { %v19_v15 = vcombine.low %v8_v0, %v14_v14  ;;  %v20_v16 = vcombine.high %v8_v0, %v14_v14 }
  0x7b   :  { %v27_v20 = vrot.slane %v19_v15, %v331_v11  ;;  %v34_v21 = vrot.slane %v20_v16, %v331_v11 }
  0x7d   :  { %v51_v22 = vcombine.low %v27_v20, %v43_v18  ;;  %v52_v23 = vcombine.high %v27_v20, %v43_v18  ;;  %v67_v24 = vcombine.low %v34_v21, %v50_v19  ;;  %v68_v27 = vcombine.high %v34_v21, %v50_v19 }
  0x7f   :  { %v66_v25 = vrot.slane %v52_v23, %v333_v17  ;;  %v59_v26 = vrot.slane %v51_v22, %v333_v17  ;;  %v75_v30 = vrot.slane %v67_v24, %v333_v17  ;;  %v82_v33 = vrot.slane %v68_v27, %v333_v17 }
  0x81   :  { %v94_v28 = vsel %vm87_vm0, %v66_v25, -inf  ;;  %v88_v29 = vsel %vm87_vm0, %v59_v26, -inf  ;;  %v84_v32 = vcombine.high %v66_v25, %v314_v31  ;;  %v100_v34 = vsel %vm87_vm0, %v75_v30, -inf }
  0x82   :  { %95 = vmax.xlane.f32.xlu0 %v94_v28  ;;  %89 = vmax.xlane.f32.xlu1 %v88_v29  ;;  %v85_v36 = vcombine.high %v75_v30, %v314_v31  ;;  %v83_v37 = vcombine.high %v59_v26, %v314_v31  ;;  %v86_v40 = vcombine.high %v82_v33, %v314_v31  ;;  %v106_v42 = vsel %vm87_vm0, %v82_v33, -inf }
  0x83   :  { %v97_v35 = vsel %vm87_vm0, %v84_v32, -inf }
  0x84   :  { %v103_v38 = vsel %vm87_vm0, %v85_v36, -inf  ;;  %v91_v39 = vsel %vm87_vm0, %v83_v37, -inf  ;;  %v109_v41 = vsel %vm87_vm0, %v86_v40, -inf }
  0x86   :  { %101 = vmax.xlane.f32.xlu0 %v100_v34  ;;  %98 = vmax.xlane.f32.xlu1 %v97_v35 }
  0x8a   :  { %104 = vmax.xlane.f32.xlu1 %v103_v38  ;;  %92 = vmax.xlane.f32.xlu0 %v91_v39 }
  0x8e   :  { %110 = vmax.xlane.f32.xlu1 %v109_v41  ;;  %107 = vmax.xlane.f32.xlu0 %v106_v42 }
 0x10f   :  { %v96_v43 = vpop.xlane.xlu0 %95  ;;  %v90_v44 = vpop.xlane.xlu1 %89 }
 0x110   :  { %v114_v45 = vsub.f32 %v66_v25, %v96_v43  ;;  %v112_v46 = vsub.f32 %v59_v26, %v90_v44 }
 0x112   :  { %v120_v47 = vmul.f32 1.442695, %v112_v46  ;;  %v124_v48 = vmul.f32 1.442695, %v114_v45 }
 0x113   :  { %v102_v49 = vpop.xlane.xlu0 %101  ;;  %v99_v50 = vpop.xlane.xlu1 %98 }
 0x114   :  { %v116_v51 = vsub.f32 %v75_v30, %v102_v49  ;;  %277 = vpow2.f32 %v120_v47  ;;  %v115_v53 = vsub.f32 %v84_v32, %v99_v50 }
 0x115   :  { %279 = vpow2.f32 %v124_v48 }
 0x116   :  { %v128_v52 = vmul.f32 1.442695, %v116_v51  ;;  %v126_v58 = vmul.f32 1.442695, %v115_v53 }
 0x117   :  { %v105_v54 = vpop.xlane.xlu1 %104  ;;  %v93_v55 = vpop.xlane.xlu0 %92 }
 0x118   :  { %v113_v56 = vsub.f32 %v83_v37, %v93_v55  ;;  %281 = vpow2.f32 %v128_v52  ;;  %v117_v59 = vsub.f32 %v85_v36, %v105_v54 }
 0x11a   :  { %v122_v57 = vmul.f32 1.442695, %v113_v56  ;;  %v130_v1 = vmul.f32 1.442695, %v117_v59 }
 0x11b   :  { %v108_v60 = vpop.xlane.xlu0 %107  ;;  %v111_v61 = vpop.xlane.xlu1 %110 }
 0x11c   :  { %v118_v62 = vsub.f32 %v82_v33, %v108_v60  ;;  %283 = vpow2.f32 %v122_v57  ;;  %v119_v2 = vsub.f32 %v86_v40, %v111_v61 }
 0x11d   :  { %285 = vpow2.f32 %v126_v58 }
 0x11e   :  { %v132_v63 = vmul.f32 1.442695, %v118_v62  ;;  %v278_v0 = vpop.eup %277  ;;  %v134_v5 = vmul.f32 1.442695, %v119_v2 }
 0x11f   :  { %v136_v3 = vsel %vm87_vm0, %v278_v0, 0.0  ;;  %v280_v4 = vpop.eup %279 }
 0x120   :  { %287 = vpow2.f32 %v132_v63  ;;  %137 = vadd.xlane.f32.xlu0 %v136_v3  ;;  %v142_v6 = vsel %vm87_vm0, %v280_v4, 0.0 }
 0x121   :  { %289 = vpow2.f32 %v130_v1 }
 0x122   :  { %v282_v7 = vpop.eup %281  ;;  %291 = vpow2.f32 %v134_v5 }
 0x123   :  { %v148_v9 = vsel %vm87_vm0, %v282_v7, 0.0 }
 0x124   :  { %143 = vadd.xlane.f32.xlu0 %v142_v6 }
 0x126   :  { %v284_v8 = vpop.eup %283 }
 0x127   :  { %v139_v10 = vsel %vm87_vm0, %v284_v8, 0.0  ;;  %v286_v12 = vpop.eup %285 }
 0x128   :  { %149 = vadd.xlane.f32.xlu0 %v148_v9  ;;  %140 = vadd.xlane.f32.xlu1 %v139_v10  ;;  %v145_v14 = vsel %vm87_vm0, %v286_v12, 0.0 }
 0x12a   :  { %v288_v13 = vpop.eup %287 }
 0x12b   :  { %v154_v15 = vsel %vm87_vm0, %v288_v13, 0.0  ;;  %v290_v16 = vpop.eup %289 }
 0x12c   :  { %146 = vadd.xlane.f32.xlu1 %v145_v14  ;;  %155 = vadd.xlane.f32.xlu0 %v154_v15  ;;  %v151_v18 = vsel %vm87_vm0, %v290_v16, 0.0  ;;  %v292_v19 = vpop.eup %291 }
 0x12d   :  { %v157_v20 = vsel %vm87_vm0, %v292_v19, 0.0 }
 0x130   :  { %152 = vadd.xlane.f32.xlu1 %v151_v18 }
 0x134   :  { %158 = vadd.xlane.f32.xlu1 %v157_v20 }
 0x1ad   :  { %v138_v21 = vpop.xlane.xlu0 %137 }
 0x1b1   :  { %v144_v22 = vpop.xlane.xlu0 %143 }
 0x1b2   :  { %293 = vrcp.f32 %v144_v22 }
 0x1b5   :  { %v141_v23 = vpop.xlane.xlu1 %140  ;;  %v150_v24 = vpop.xlane.xlu0 %149 }
 0x1b6   :  { %295 = vrcp.f32 %v141_v23 }
 0x1b9   :  { %v147_v25 = vpop.xlane.xlu1 %146  ;;  %v156_v26 = vpop.xlane.xlu0 %155 }
 0x1ba   :  { %297 = vrcp.f32 %v147_v25 }
 0x1bb   :  { %299 = vrcp.f32 %v138_v21 }
 0x1bc   :  { %301 = vrcp.f32 %v156_v26  ;;  %v294_v29 = vpop.eup %293 }
 0x1bd   :  { %v153_v27 = vpop.xlane.xlu1 %152  ;;  %303 = vrcp.f32 %v150_v24  ;;  %v170_v35 = vmul.f32 %v294_v29, %v280_v4 }
 0x1be   :  { %305 = vrcp.f32 %v153_v27 }
 0x1c0   :  { %v296_v30 = vpop.eup %295 }
 0x1c1   :  { %v159_v28 = vpop.xlane.xlu1 %158  ;;  %v169_v36 = vmul.f32 %v296_v30, %v284_v8 }
 0x1c2   :  { %307 = vrcp.f32 %v159_v28 }
 0x1c4   :  { %v298_v31 = vpop.eup %297 }
 0x1c5   :  { %v300_v32 = vpop.eup %299  ;;  %v171_v33 = vmul.f32 %v298_v31, %v286_v12 }
 0x1c6   :  { %v302_v34 = vpop.eup %301  ;;  %v168_v38 = vmul.f32 %v300_v32, %v278_v0 }
 0x1c7   :  { %v304_v37 = vpop.eup %303  ;;  %v174_v39 = vmul.f32 %v302_v34, %v288_v13  ;;  %v184_v40 = vcombine.low %v169_v36, %v171_v33 }
 0x1c8   :  { %v306_v41 = vpop.eup %305  ;;  %v172_v42 = vmul.f32 %v304_v37, %v282_v7  ;;  %v176_v43 = vcombine.low %v168_v38, %v170_v35 }
 0x1c9   :  { %v173_v45 = vmul.f32 %v306_v41, %v290_v16  ;;  %v191_v47 = vrot.slane %v184_v40, %v331_v11 }
 0x1ca   :  { %v192_v48 = vcombine.low %v172_v42, %v174_v39  ;;  %v183_v49 = vrot.slane %v176_v43, %v331_v11 }
 0x1cc   :  { %v308_v44 = vpop.eup %307  ;;  %v199_v51 = vrot.slane %v192_v48, %v331_v11  ;;  %v209_v53 = vcombine.high %v183_v49, %v191_v47  ;;  %v208_v54 = vcombine.low %v183_v49, %v191_v47 }
 0x1cd   :  { %v175_v46 = vmul.f32 %v308_v44, %v292_v19 }
 0x1ce   :  { %v223_v57 = vrot.slane %v209_v53, %v333_v17  ;;  %v216_v59 = vrot.slane %v208_v54, %v333_v17 }
 0x1cf   :  { %v200_v50 = vcombine.low %v173_v45, %v175_v46 }
 0x1d1   :  { %v207_v52 = vrot.slane %v200_v50, %v331_v11 }
 0x1d3   :  { %v225_v55 = vcombine.high %v199_v51, %v207_v52  ;;  %v224_v56 = vcombine.low %v199_v51, %v207_v52 }
 0x1d5   :  { %v239_v58 = vrot.slane %v225_v55, %v333_v17  ;;  %v232_v60 = vrot.slane %v224_v56, %v333_v17 }
 0x1d7   :  { %v242_v61 = vcombine.low %v223_v57, %v239_v58  ;;  %v241_v62 = vcombine.high %v216_v59, %v232_v60  ;;  %v240_v63 = vcombine.low %v216_v59, %v232_v60  ;;  %v243_v11 = vcombine.high %v223_v57, %v239_v58 }
 0x1d9   :  { %249 = vrot.lane.b32.xlu1 %v242_v61, %s315_s0  ;;  %245 = vrot.lane.b32.xlu0 %v241_v62, %s316_s11 }
 0x1dd   :  { %253 = vrot.lane.b32.xlu1 %v243_v11, %s317_s12 }
 0x24b   :  { %v250_v0 = vpop.permute.xlu1 %249  ;;  %v246_v1 = vpop.permute.xlu0 %245 }
 0x24c   :  { %v257_v2 = vsel %vm256_vm1, %v240_v63, %v246_v1 }
 0x24d   :  { %v259_v4 = vsel %vm258_vm2, %v257_v2, %v250_v0 }
 0x24f   :  { %v254_v3 = vpop.permute.xlu1 %253 }
 0x250   :  { %v261_v17 = vsel %vm260_vm3, %v259_v4, %v254_v3 }
 0x251   :  { %263 = vst.msk [vmem:[%s371_s1] sm:$0xff] %vm262_vm4, %v261_v17 }

</bundles_post_ra>
